<compile_context>
chip_gen: v5e
topology: v5e:2x2
jax: 0.10.0
libtpu: 0.0.40
codegen_flags: <defaults>
</compile_context>

<pallas_src>
import numpy as np
import jax
import jax.numpy as jnp
from jax.experimental import pallas as pl
from jax.experimental.pallas import tpu as pltpu

_LANE = 128
_SUBLANE = 8
_X_RESIDENT_MAX_BYTES = 4 * 1024 * 1024   # keep x fully VMEM-resident below this


def _round_up(v, m):
    return ((v + m - 1) // m) * m


def _choose_tiling(n):
    """Pick (n_pad, tm, tk) with n_pad % tm == n_pad % tk == 0, TPU-aligned."""
    n128 = _round_up(max(n, 1), _LANE)
    if n128 <= 1024:
        return n128, n128, n128           # single adjacency tile
    tk = 2048 if n128 >= 2048 else 1024   # tk % tm == 0  =>  n_pad % tm == 0
    tm = 512
    return _round_up(n, tk), tm, tk


def _pad2(a, rows, cols, dtype):
    a = jnp.asarray(a)
    out = jnp.zeros((rows, cols), dtype)
    return out.at[: a.shape[0], : a.shape[1]].set(a.astype(dtype))


# ----------------------------------------------------------------------------
# Pallas kernels
# ----------------------------------------------------------------------------
def _make_gin_layer_kernel(*, eps, tk, x_resident):
    """One GIN layer: block-sparse aggregation + fused MLP epilogue."""
    one_plus_eps = float(1.0 + eps)

    def kernel(ids_ref, cnt_ref, adj_ref, xsrc_ref, xself_ref,
               w1_ref, b1_ref, bns_ref, bnh_ref, w2_ref, b2_ref,
               out_ref, acc_ref):
        i = pl.program_id(0)
        k = pl.program_id(1)

        @pl.when(k == 0)
        def _():
            acc_ref[...] = jnp.zeros_like(acc_ref)

        # Only non-empty adjacency blocks contribute (padded schedule entries
        # repeat the last valid block index -> no re-DMA, and are skipped here).
        @pl.when(k < cnt_ref[i])
        def _():
            a = adj_ref[...].astype(jnp.bfloat16)          # int8 tile -> MXU bf16
            if x_resident:
                kt = ids_ref[i, k]
                start = pl.multiple_of(kt * tk, tk)
                xs = xsrc_ref[pl.ds(start, tk), :]
            else:
                xs = xsrc_ref[...]
            acc_ref[...] += jnp.dot(a, xs, preferred_element_type=jnp.float32)

        @pl.when(k == pl.num_programs(1) - 1)
        def _():
            # (1+eps)*x self-term added in f32 (exact for any eps).
            h = acc_ref[...] + one_plus_eps * xself_ref[...].astype(jnp.float32)
            # MLP: Linear -> eval-BatchNorm (folded) -> ReLU -> Linear, then
            # the model-level ReLU (dropout = identity in eval mode).
            h = jnp.dot(h, w1_ref[...], preferred_element_type=jnp.float32) + b1_ref[...]
            h = h * bns_ref[...] + bnh_ref[...]
            h = jnp.maximum(h, 0.0)
            h = jnp.dot(h, w2_ref[...], preferred_element_type=jnp.float32) + b2_ref[...]
            out_ref[...] = jnp.maximum(h, 0.0).astype(out_ref.dtype)

    return kernel


def _pool_classifier_kernel(pool_ref, x_ref, w1_ref, b1_ref, w2_ref, b2_ref,
                            out_ref, acc_ref):
    """global_add_pool (one-hot pooling matmul, tiled over nodes) + classifier MLP."""
    k = pl.program_id(0)

    @pl.when(k == 0)
    def _():
        acc_ref[...] = jnp.zeros_like(acc_ref)

    acc_ref[...] += jnp.dot(pool_ref[...].astype(jnp.bfloat16), x_ref[...],
                            preferred_element_type=jnp.float32)

    @pl.when(k == pl.num_programs(0) - 1)
    def _():
        h = jnp.dot(acc_ref[...], w1_ref[...],
                    preferred_element_type=jnp.float32) + b1_ref[...]
        h = jnp.maximum(h, 0.0)                       # ReLU; dropout = id in eval
        out_ref[...] = (jnp.dot(h, w2_ref[...],
                                preferred_element_type=jnp.float32) + b2_ref[...])


def _node_classifier_kernel(x_ref, w1_ref, b1_ref, w2_ref, b2_ref, out_ref):
    """Classifier MLP per node-row tile (identity pooling skipped entirely)."""
    h = jnp.dot(x_ref[...], w1_ref[...],
                preferred_element_type=jnp.float32) + b1_ref[...]
    h = jnp.maximum(h, 0.0)
    out_ref[...] = (jnp.dot(h, w2_ref[...],
                            preferred_element_type=jnp.float32) + b2_ref[...])


# ----------------------------------------------------------------------------
# pallas_call wrappers
# ----------------------------------------------------------------------------
def _run_gin_layer(adj_i8, x_bf16, ids, counts, p, *, tm, tk, eps):
    n_pad, f_in = x_bf16.shape
    hidden = p["w1"].shape[1]
    n_rows = n_pad // tm
    max_count = ids.shape[1]
    const = lambda i, k, ids, cnt: (0, 0)

    # Keep the full feature matrix VMEM-resident when small (removes the
    # redundant per-row-tile x re-stream); otherwise stream bf16 tiles with a
    # data-dependent (block-skipping) index map.
    x_resident = n_pad * f_in * 2 <= _X_RESIDENT_MAX_BYTES
    if x_resident:
        x_src_spec = pl.BlockSpec((n_pad, f_in), const)
    else:
        x_src_spec = pl.BlockSpec((tk, f_in), lambda i, k, ids, cnt: (ids[i, k], 0))

    return pl.pallas_call(
        _make_gin_layer_kernel(eps=eps, tk=tk, x_resident=x_resident),
        out_shape=jax.ShapeDtypeStruct((n_pad, hidden), jnp.bfloat16),
        grid_spec=pltpu.PrefetchScalarGridSpec(
            num_scalar_prefetch=2,                              # ids, counts
            grid=(n_rows, max_count),
            in_specs=[
                pl.BlockSpec((tm, tk), lambda i, k, ids, cnt: (i, ids[i, k])),  # adj
                x_src_spec,                                                      # x (src)
                pl.BlockSpec((tm, f_in), lambda i, k, ids, cnt: (i, 0)),         # x (self)
                pl.BlockSpec((f_in, hidden), const),            # w1   (resident)
                pl.BlockSpec((1, hidden), const),               # b1
                pl.BlockSpec((1, hidden), const),               # bn scale
                pl.BlockSpec((1, hidden), const),               # bn shift
                pl.BlockSpec((hidden, hidden), const),          # w2
                pl.BlockSpec((1, hidden), const),               # b2
            ],
            out_specs=pl.BlockSpec((tm, hidden), lambda i, k, ids, cnt: (i, 0)),
            scratch_shapes=[pltpu.VMEM((tm, f_in), jnp.float32)],
        ),
        compiler_params=pltpu.CompilerParams(
            dimension_semantics=("parallel", "arbitrary")),
    )(ids, counts, adj_i8, x_bf16, x_bf16,
      p["w1"], p["b1"], p["bn_scale"], p["bn_shift"], p["w2"], p["b2"])


def _run_pool_classifier(pool, x, p, tk):
    g_pad = pool.shape[0]
    n_pad, hidden = x.shape
    out_ch = p["w2"].shape[1]
    const = lambda k: (0, 0)
    return pl.pallas_call(
        _pool_classifier_kernel,
        out_shape=jax.ShapeDtypeStruct((g_pad, out_ch), jnp.float32),
        grid_spec=pltpu.PrefetchScalarGridSpec(
            num_scalar_prefetch=0,
            grid=(n_pad // tk,),
            in_specs=[
                pl.BlockSpec((g_pad, tk), lambda k: (0, k)),
                pl.BlockSpec((tk, hidden), lambda k: (k, 0)),
                pl.BlockSpec((hidden, hidden), const),
                pl.BlockSpec((1, hidden), const),
                pl.BlockSpec((hidden, out_ch), const),
                pl.BlockSpec((1, out_ch), const),
            ],
            out_specs=pl.BlockSpec((g_pad, out_ch), lambda k: (0, 0)),
            scratch_shapes=[pltpu.VMEM((g_pad, hidden), jnp.float32)],
        ),
        compiler_params=pltpu.CompilerParams(
            dimension_semantics=("arbitrary",)),
    )(pool, x, p["w1"], p["b1"], p["w2"], p["b2"])


def _run_node_classifier(x, p, tm):
    n_pad, hidden = x.shape
    out_ch = p["w2"].shape[1]
    const = lambda i: (0, 0)
    return pl.pallas_call(
        _node_classifier_kernel,
        out_shape=jax.ShapeDtypeStruct((n_pad, out_ch), jnp.float32),
        grid_spec=pltpu.PrefetchScalarGridSpec(
            num_scalar_prefetch=0,
            grid=(n_pad // tm,),
            in_specs=[
                pl.BlockSpec((tm, hidden), lambda i: (i, 0)),
                pl.BlockSpec((hidden, hidden), const),
                pl.BlockSpec((1, hidden), const),
                pl.BlockSpec((hidden, out_ch), const),
                pl.BlockSpec((1, out_ch), const),
            ],
            out_specs=pl.BlockSpec((tm, out_ch), lambda i: (i, 0)),
        ),
        compiler_params=pltpu.CompilerParams(
            dimension_semantics=("parallel",)),
    )(x, p["w1"], p["b1"], p["w2"], p["b2"])


# ----------------------------------------------------------------------------
# Graph / parameter preparation (hoistable: static across forward calls)
# ----------------------------------------------------------------------------
def prepare_graph(edge_index, n_pad, tm, tk):
    """Build the int8 dense adjacency and the block-sparse tile schedule.

    A[dst, src] = edge multiplicity ('add' aggregation, source_to_target flow).
    NOTE: int8 storage is exact for edge multiplicities <= 127.
    """
    src, dst = edge_index[0], edge_index[1]
    # Scatter-add in int32 (universally supported), store as int8 for HBM.
    adj = jnp.zeros((n_pad, n_pad), jnp.int32).at[dst, src].add(1).astype(jnp.int8)

    # Per-row-tile schedule of non-empty K tiles (host side; graph topology is
    # static per call, so this should be hoisted/cached for repeated forwards).
    n_rows, n_kt = n_pad // tm, n_pad // tk
    blk = jnp.any(adj.reshape(n_rows, tm, n_kt, tk) != 0, axis=(1, 3))
    blk = np.asarray(jax.device_get(blk))
    counts = blk.sum(axis=1).astype(np.int32)
    max_count = max(int(counts.max()) if counts.size else 1, 1)
    ids = np.zeros((n_rows, max_count), np.int32)
    for r in range(n_rows):
        nz = np.nonzero(blk[r])[0]
        if nz.size:
            ids[r, : nz.size] = nz
            ids[r, nz.size:] = nz[-1]   # repeat last idx -> padded steps skip DMA
    return adj, jnp.asarray(ids), jnp.asarray(counts)


def _pad_params(params, f_pad, h_pad, o_pad):
    padded_convs = []
    for i, cp in enumerate(params["convs"]):
        fin_pad = f_pad if i == 0 else h_pad
        padded_convs.append(dict(
            w1=_pad2(cp["w1"], fin_pad, h_pad, jnp.float32),
            b1=_pad2(cp["b1"], 1, h_pad, jnp.float32),
            bn_scale=_pad2(cp["bn_scale"], 1, h_pad, jnp.float32),
            bn_shift=_pad2(cp["bn_shift"], 1, h_pad, jnp.float32),
            w2=_pad2(cp["w2"], h_pad, h_pad, jnp.float32),
            b2=_pad2(cp["b2"], 1, h_pad, jnp.float32)))
    clf = params["classifier"]
    padded_clf = dict(
        w1=_pad2(clf["w1"], h_pad, h_pad, jnp.float32),
        b1=_pad2(clf["b1"], 1, h_pad, jnp.float32),
        w2=_pad2(clf["w2"], h_pad, o_pad, jnp.float32),
        b2=_pad2(clf["b2"], 1, o_pad, jnp.float32))
    return padded_convs, padded_clf


# ----------------------------------------------------------------------------
# Model wrapper
# ----------------------------------------------------------------------------
def init_params(key, in_channels, hidden_channels, out_channels, num_layers):
    """Deterministic parameter init (shapes match the PyTorch module, eval mode)."""
    params = {"convs": [], "classifier": None}

    def linear(k, fin, fout):
        k1, k2 = jax.random.split(k)
        bound = 1.0 / jnp.sqrt(float(fin))
        w = jax.random.uniform(k1, (fin, fout), jnp.float32, -bound, bound)
        b = jax.random.uniform(k2, (1, fout), jnp.float32, -bound, bound)
        return w, b

    for i in range(num_layers):
        fin = in_channels if i == 0 else hidden_channels
        key, k1, k2 = jax.random.split(key, 3)
        w1, b1 = linear(k1, fin, hidden_channels)
        w2, b2 = linear(k2, hidden_channels, hidden_channels)
        # eval-mode BatchNorm1d with default stats/affine, folded to scale/shift
        gamma = jnp.ones((1, hidden_channels), jnp.float32)
        beta = jnp.zeros((1, hidden_channels), jnp.float32)
        running_mean = jnp.zeros((1, hidden_channels), jnp.float32)
        running_var = jnp.ones((1, hidden_channels), jnp.float32)
        bn_eps = 1e-5
        scale = gamma / jnp.sqrt(running_var + bn_eps)
        shift = beta - running_mean * scale
        params["convs"].append(
            dict(w1=w1, b1=b1, w2=w2, b2=b2, bn_scale=scale, bn_shift=shift))

    key, k1, k2 = jax.random.split(key, 3)
    cw1, cb1 = linear(k1, hidden_channels, hidden_channels)
    cw2, cb2 = linear(k2, hidden_channels, out_channels)
    params["classifier"] = dict(w1=cw1, b1=cb1, w2=cw2, b2=cb2)
    return params


def gin_forward(params, x, edge_index, batch=None, *, num_graphs=1, eps=0.0):
    """Forward pass of CuGraphDistributedGIN (eval mode, act='relu')."""
    n, in_ch = x.shape
    hidden = params["convs"][0]["w2"].shape[1]
    out_ch = params["classifier"]["w2"].shape[1]

    n_pad, tm, tk = _choose_tiling(n)
    f_pad = _round_up(in_ch, _LANE)
    h_pad = _round_up(hidden, _LANE)
    o_pad = _round_up(out_ch, _LANE)

    # Graph/parameter prep (hoist these out when topology/params are static).
    adj, ids, counts = prepare_graph(edge_index, n_pad, tm, tk)
    padded_convs, padded_clf = _pad_params(params, f_pad, h_pad, o_pad)

    # Activations live in HBM as bf16 (exact zero padding; padded rows/cols
    # only ever contribute zeros and are sliced off at the end).
    h = _pad2(x, n_pad, f_pad, jnp.bfloat16)

    for cp in padded_convs:
        h = _run_gin_layer(adj, h, ids, counts, cp, tm=tm, tk=tk, eps=eps)

    if batch is not None:
        # global_add_pool as a one-hot pooling matmul; graph rows padded to 8
        # sublanes, padded nodes map nowhere.
        g_pad = _round_up(max(num_graphs, 1), _SUBLANE)
        pool = jnp.zeros((g_pad, n_pad), jnp.float32)
        pool = pool.at[batch, jnp.arange(n)].set(jnp.ones((n,), jnp.float32))
        out = _run_pool_classifier(pool, h, padded_clf, tk)
        return out[:num_graphs, :out_ch]

    # Node-level output: identity pooling matmul is skipped entirely.
    out = _run_node_classifier(h, padded_clf, tm)
    return out[:n, :out_ch]


# ----------------------------------------------------------------------------
# Example
# ----------------------------------------------------------------------------
if __name__ == "__main__":
    N = 16             # nodes
    E = 40             # edges
    IN_CH = 8
    HIDDEN = 32
    OUT_CH = 8
    NUM_LAYERS = 2
    NUM_GRAPHS = 2

    key = jax.random.PRNGKey(0)
    kx, ke, kp = jax.random.split(key, 3)

    x = jax.random.normal(kx, (N, IN_CH), jnp.float32)
    edge_index = jax.random.randint(ke, (2, E), 0, N, dtype=jnp.int32)
    batch = jnp.concatenate(
        [jnp.zeros((N // 2,), jnp.int32), jnp.ones((N - N // 2,), jnp.int32)])

    params = init_params(kp, IN_CH, HIDDEN, OUT_CH, NUM_LAYERS)

    out = gin_forward(params, x, edge_index, batch,
                      num_graphs=NUM_GRAPHS, eps=0.0)
    out = jax.block_until_ready(out)

    assert out.shape == (NUM_GRAPHS, OUT_CH), out.shape
    assert out.dtype == jnp.float32
    assert bool(jnp.all(jnp.isfinite(out)))
    print("KERNEL_OK")
</pallas_src>

<mosaic_0001>
module attributes {stable_mosaic.version = 11 : i64} {
  func.func @kernel(%arg0: i32, %arg1: i32, %arg2: memref<1x1xi32, #tpu.memory_space<smem>>, %arg3: memref<1xi32, #tpu.memory_space<smem>>, %arg4: memref<128x128xi8, #tpu.memory_space<vmem>>, %arg5: memref<128x128xbf16, #tpu.memory_space<vmem>>, %arg6: memref<128x128xbf16, #tpu.memory_space<vmem>>, %arg7: memref<128x128xf32, #tpu.memory_space<vmem>>, %arg8: memref<1x128xf32, #tpu.memory_space<vmem>>, %arg9: memref<1x128xf32, #tpu.memory_space<vmem>>, %arg10: memref<1x128xf32, #tpu.memory_space<vmem>>, %arg11: memref<128x128xf32, #tpu.memory_space<vmem>>, %arg12: memref<1x128xf32, #tpu.memory_space<vmem>>, %arg13: memref<128x128xbf16, #tpu.memory_space<vmem>>, %arg14: memref<128x128xf32, #tpu.memory_space<vmem>>) attributes {dimension_semantics = [#tpu.dimension_semantics<parallel>, #tpu.dimension_semantics<arbitrary>], iteration_bounds = array<i64: 1, 1>, scalar_prefetch = 2 : i64, scratch_operands = 1 : i64, tpu.core_type = #tpu.core_type<tc>, window_params = [{transform_indices = @transform_0, window_bounds = array<i64: 128, 128>}, {pipeline_mode = #tpu.pipeline_mode<synchronous>, transform_indices = @transform_1, window_bounds = array<i64: 128, 128>}, {transform_indices = @transform_2, window_bounds = array<i64: 128, 128>}, {pipeline_mode = #tpu.pipeline_mode<synchronous>, transform_indices = @transform_3, window_bounds = array<i64: 128, 128>}, {pipeline_mode = #tpu.pipeline_mode<synchronous>, transform_indices = @transform_4, window_bounds = array<i64: 1, 128>}, {pipeline_mode = #tpu.pipeline_mode<synchronous>, transform_indices = @transform_5, window_bounds = array<i64: 1, 128>}, {pipeline_mode = #tpu.pipeline_mode<synchronous>, transform_indices = @transform_6, window_bounds = array<i64: 1, 128>}, {pipeline_mode = #tpu.pipeline_mode<synchronous>, transform_indices = @transform_7, window_bounds = array<i64: 128, 128>}, {pipeline_mode = #tpu.pipeline_mode<synchronous>, transform_indices = @transform_8, window_bounds = array<i64: 1, 128>}, {transform_indices = @transform_9, window_bounds = array<i64: 128, 128>}]} {
    %c0_i32 = arith.constant 0 : i32
    %0 = arith.cmpi eq, %arg1, %c0_i32 : i32
    %1 = arith.extui %0 : i1 to i32
    %c0_i32_0 = arith.constant 0 : i32
    %2 = arith.cmpi ne, %1, %c0_i32_0 : i32
    scf.if %2 {
      %cst = arith.constant 0.000000e+00 : f32
      %11 = vector.broadcast %cst : f32 to vector<128x128xf32>
      %c0 = arith.constant 0 : index
      %c0_4 = arith.constant 0 : index
      %12 = vector.load %arg14[%c0, %c0_4] : memref<128x128xf32, #tpu.memory_space<vmem>>, vector<128x128xf32>
      tpu.vector_store %arg14[%c0, %c0_4], %11 {strides = array<i32>} : memref<128x128xf32, #tpu.memory_space<vmem>>, vector<128x128xf32>,
    } else {
    }
    %3 = arith.index_cast %arg0 : i32 to index
    %4 = memref.load %arg3[%3] : memref<1xi32, #tpu.memory_space<smem>>
    %5 = arith.cmpi slt, %arg1, %4 : i32
    %6 = arith.extui %5 : i1 to i32
    %c0_i32_1 = arith.constant 0 : i32
    %7 = arith.cmpi ne, %6, %c0_i32_1 : i32
    scf.if %7 {
      %c0 = arith.constant 0 : index
      %c0_4 = arith.constant 0 : index
      %11 = vector.load %arg4[%c0, %c0_4] : memref<128x128xi8, #tpu.memory_space<vmem>>, vector<128x128xi8>
      %12 = arith.sitofp %11 : vector<128x128xi8> to vector<128x128xbf16>
      %13 = arith.index_cast %arg0 : i32 to index
      %14 = arith.index_cast %arg1 : i32 to index
      %15 = memref.load %arg2[%13, %14] : memref<1x1xi32, #tpu.memory_space<smem>>
      %c128_i32 = arith.constant 128 : i32
      %16 = arith.muli %15, %c128_i32 : i32
      %17 = tpu.assume_multiple %16, 128 : i32
      %18 = arith.index_cast %17 : i32 to index
      %c0_5 = arith.constant 0 : index
      %19 = vector.load %arg5[%18, %c0_5] : memref<128x128xbf16, #tpu.memory_space<vmem>>, vector<128x128xbf16>
      %c0_6 = arith.constant 0 : index
      %c0_7 = arith.constant 0 : index
      %20 = vector.load %arg14[%c0_6, %c0_7] : memref<128x128xf32, #tpu.memory_space<vmem>>, vector<128x128xf32>
      %cst = arith.constant dense<0.000000e+00> : vector<128x128xf32>
      %21 = tpu.matmul %12, %19, %cst {dimension_numbers = #tpu.dot_dimension_numbers<[1], [0], [0], [1], [0, 0, 1, 1], [], []>} : vector<128x128xbf16>, vector<128x128xbf16>, vector<128x128xf32> -> vector<128x128xf32>
      %22 = arith.addf %20, %21 : vector<128x128xf32>
      %c0_8 = arith.constant 0 : index
      %c0_9 = arith.constant 0 : index
      %23 = vector.load %arg14[%c0_8, %c0_9] : memref<128x128xf32, #tpu.memory_space<vmem>>, vector<128x128xf32>
      tpu.vector_store %arg14[%c0_8, %c0_9], %22 {strides = array<i32>} : memref<128x128xf32, #tpu.memory_space<vmem>>, vector<128x128xf32>,
    } else {
    }
    %c0_i32_2 = arith.constant 0 : i32
    %8 = arith.cmpi eq, %arg1, %c0_i32_2 : i32
    %9 = arith.extui %8 : i1 to i32
    %c0_i32_3 = arith.constant 0 : i32
    %10 = arith.cmpi ne, %9, %c0_i32_3 : i32
    scf.if %10 {
      %c0 = arith.constant 0 : index
      %c0_4 = arith.constant 0 : index
      %11 = vector.load %arg14[%c0, %c0_4] : memref<128x128xf32, #tpu.memory_space<vmem>>, vector<128x128xf32>
      %c0_5 = arith.constant 0 : index
      %c0_6 = arith.constant 0 : index
      %12 = vector.load %arg6[%c0_5, %c0_6] : memref<128x128xbf16, #tpu.memory_space<vmem>>, vector<128x128xbf16>
      %13 = arith.extf %12 : vector<128x128xbf16> to vector<128x128xf32>
      %cst = arith.constant 1.000000e+00 : f32
      %14 = vector.broadcast %cst : f32 to vector<128x128xf32>
      %15 = arith.mulf %14, %13 : vector<128x128xf32>
      %16 = arith.addf %11, %15 : vector<128x128xf32>
      %c0_7 = arith.constant 0 : index
      %c0_8 = arith.constant 0 : index
      %17 = vector.load %arg7[%c0_7, %c0_8] : memref<128x128xf32, #tpu.memory_space<vmem>>, vector<128x128xf32>
      %cst_9 = arith.constant dense<0.000000e+00> : vector<128x128xf32>
      %18 = tpu.matmul %16, %17, %cst_9 {dimension_numbers = #tpu.dot_dimension_numbers<[1], [0], [0], [1], [0, 0, 1, 1], [], []>} : vector<128x128xf32>, vector<128x128xf32>, vector<128x128xf32> -> vector<128x128xf32>
      %c0_10 = arith.constant 0 : index
      %c0_11 = arith.constant 0 : index
      %19 = vector.load %arg8[%c0_10, %c0_11] : memref<1x128xf32, #tpu.memory_space<vmem>>, vector<1x128xf32>
      %20 = vector.broadcast %19 : vector<1x128xf32> to vector<128x128xf32>
      %21 = arith.addf %18, %20 : vector<128x128xf32>
      %c0_12 = arith.constant 0 : index
      %c0_13 = arith.constant 0 : index
      %22 = vector.load %arg9[%c0_12, %c0_13] : memref<1x128xf32, #tpu.memory_space<vmem>>, vector<1x128xf32>
      %23 = vector.broadcast %22 : vector<1x128xf32> to vector<128x128xf32>
      %24 = arith.mulf %21, %23 : vector<128x128xf32>
      %c0_14 = arith.constant 0 : index
      %c0_15 = arith.constant 0 : index
      %25 = vector.load %arg10[%c0_14, %c0_15] : memref<1x128xf32, #tpu.memory_space<vmem>>, vector<1x128xf32>
      %26 = vector.broadcast %25 : vector<1x128xf32> to vector<128x128xf32>
      %27 = arith.addf %24, %26 : vector<128x128xf32>
      %cst_16 = arith.constant 0.000000e+00 : f32
      %28 = vector.broadcast %cst_16 : f32 to vector<128x128xf32>
      %29 = arith.maximumf %27, %28 : vector<128x128xf32>
      %c0_17 = arith.constant 0 : index
      %c0_18 = arith.constant 0 : index
      %30 = vector.load %arg11[%c0_17, %c0_18] : memref<128x128xf32, #tpu.memory_space<vmem>>, vector<128x128xf32>
      %cst_19 = arith.constant dense<0.000000e+00> : vector<128x128xf32>
      %31 = tpu.matmul %29, %30, %cst_19 {dimension_numbers = #tpu.dot_dimension_numbers<[1], [0], [0], [1], [0, 0, 1, 1], [], []>} : vector<128x128xf32>, vector<128x128xf32>, vector<128x128xf32> -> vector<128x128xf32>
      %c0_20 = arith.constant 0 : index
      %c0_21 = arith.constant 0 : index
      %32 = vector.load %arg12[%c0_20, %c0_21] : memref<1x128xf32, #tpu.memory_space<vmem>>, vector<1x128xf32>
      %33 = vector.broadcast %32 : vector<1x128xf32> to vector<128x128xf32>
      %34 = arith.addf %31, %33 : vector<128x128xf32>
      %cst_22 = arith.constant 0.000000e+00 : f32
      %35 = vector.broadcast %cst_22 : f32 to vector<128x128xf32>
      %36 = arith.maximumf %34, %35 : vector<128x128xf32>
      %37 = arith.truncf %36 : vector<128x128xf32> to vector<128x128xbf16>
      %c0_23 = arith.constant 0 : index
      %c0_24 = arith.constant 0 : index
      %38 = vector.load %arg13[%c0_23, %c0_24] : memref<128x128xbf16, #tpu.memory_space<vmem>>, vector<128x128xbf16>
      tpu.vector_store %arg13[%c0_23, %c0_24], %37 {strides = array<i32>} : memref<128x128xbf16, #tpu.memory_space<vmem>>, vector<128x128xbf16>,
    } else {
    }
    return
  }
  func.func @transform_0(%arg0: i32, %arg1: i32, %arg2: memref<1x1xi32, #tpu.memory_space<smem>>, %arg3: memref<1xi32, #tpu.memory_space<smem>>) -> (i32, i32) {
    %0 = arith.index_cast %arg0 : i32 to index
    %1 = arith.index_cast %arg1 : i32 to index
    %2 = memref.load %arg2[%0, %1] : memref<1x1xi32, #tpu.memory_space<smem>>
    %c0_i32 = arith.constant 0 : i32
    return %arg0, %2 : i32, i32
  }
  func.func @transform_1(%arg0: i32, %arg1: i32, %arg2: memref<1x1xi32, #tpu.memory_space<smem>>, %arg3: memref<1xi32, #tpu.memory_space<smem>>) -> (i32, i32) {
    %c0_i32 = arith.constant 0 : i32
    %c0_i32_0 = arith.constant 0 : i32
    %c0_i32_1 = arith.constant 0 : i32
    return %c0_i32, %c0_i32_0 : i32, i32
  }
  func.func @transform_2(%arg0: i32, %arg1: i32, %arg2: memref<1x1xi32, #tpu.memory_space<smem>>, %arg3: memref<1xi32, #tpu.memory_space<smem>>) -> (i32, i32) {
    %c0_i32 = arith.constant 0 : i32
    %c0_i32_0 = arith.constant 0 : i32
    return %arg0, %c0_i32 : i32, i32
  }
  func.func @transform_3(%arg0: i32, %arg1: i32, %arg2: memref<1x1xi32, #tpu.memory_space<smem>>, %arg3: memref<1xi32, #tpu.memory_space<smem>>) -> (i32, i32) {
    %c0_i32 = arith.constant 0 : i32
    %c0_i32_0 = arith.constant 0 : i32
    %c0_i32_1 = arith.constant 0 : i32
    return %c0_i32, %c0_i32_0 : i32, i32
  }
  func.func @transform_4(%arg0: i32, %arg1: i32, %arg2: memref<1x1xi32, #tpu.memory_space<smem>>, %arg3: memref<1xi32, #tpu.memory_space<smem>>) -> (i32, i32) {
    %c0_i32 = arith.constant 0 : i32
    %c0_i32_0 = arith.constant 0 : i32
    %c0_i32_1 = arith.constant 0 : i32
    return %c0_i32, %c0_i32_0 : i32, i32
  }
  func.func @transform_5(%arg0: i32, %arg1: i32, %arg2: memref<1x1xi32, #tpu.memory_space<smem>>, %arg3: memref<1xi32, #tpu.memory_space<smem>>) -> (i32, i32) {
    %c0_i32 = arith.constant 0 : i32
    %c0_i32_0 = arith.constant 0 : i32
    %c0_i32_1 = arith.constant 0 : i32
    return %c0_i32, %c0_i32_0 : i32, i32
  }
  func.func @transform_6(%arg0: i32, %arg1: i32, %arg2: memref<1x1xi32, #tpu.memory_space<smem>>, %arg3: memref<1xi32, #tpu.memory_space<smem>>) -> (i32, i32) {
    %c0_i32 = arith.constant 0 : i32
    %c0_i32_0 = arith.constant 0 : i32
    %c0_i32_1 = arith.constant 0 : i32
    return %c0_i32, %c0_i32_0 : i32, i32
  }
  func.func @transform_7(%arg0: i32, %arg1: i32, %arg2: memref<1x1xi32, #tpu.memory_space<smem>>, %arg3: memref<1xi32, #tpu.memory_space<smem>>) -> (i32, i32) {
    %c0_i32 = arith.constant 0 : i32
    %c0_i32_0 = arith.constant 0 : i32
    %c0_i32_1 = arith.constant 0 : i32
    return %c0_i32, %c0_i32_0 : i32, i32
  }
  func.func @transform_8(%arg0: i32, %arg1: i32, %arg2: memref<1x1xi32, #tpu.memory_space<smem>>, %arg3: memref<1xi32, #tpu.memory_space<smem>>) -> (i32, i32) {
    %c0_i32 = arith.constant 0 : i32
    %c0_i32_0 = arith.constant 0 : i32
    %c0_i32_1 = arith.constant 0 : i32
    return %c0_i32, %c0_i32_0 : i32, i32
  }
  func.func @transform_9(%arg0: i32, %arg1: i32, %arg2: memref<1x1xi32, #tpu.memory_space<smem>>, %arg3: memref<1xi32, #tpu.memory_space<smem>>) -> (i32, i32) {
    %c0_i32 = arith.constant 0 : i32
    %c0_i32_0 = arith.constant 0 : i32
    return %arg0, %c0_i32 : i32, i32
  }
}

</mosaic_0001>

<bundles_post_ra>
// kernel: tpu_custom_call.1
= control target key start
LH: loop header
LB: loop body
LE: loop exit
PB: predicated region body
PF: predicated region fallthrough
CT: control target
= control target key end

     0   :  { %s1279_s0 = inlined_call_operand.<no memory space> [shape: s32[1,1], index: 0, kind: input, shape index: {}]   ;;  %s1280_s1 = inlined_call_operand.<no memory space> [shape: s32[1], index: 1, kind: input, shape index: {}]   ;;  %s1281_s2 = inlined_call_operand.hbm [shape: s8[128,128], index: 2, kind: input, shape index: {}]   ;;  %s1282_s3 = inlined_call_operand.hbm [shape: bf16[128,128], index: 3, kind: input, shape index: {}]   ;;  %s1283_s4 = inlined_call_operand.hbm [shape: bf16[128,128], index: 4, kind: input, shape index: {}]   ;;  %s1284_s5 = inlined_call_operand.hbm [shape: f32[128,128], index: 5, kind: input, shape index: {}]   ;;  %s1285_s6 = inlined_call_operand.vmem [shape: f32[1,128], index: 6, kind: input, shape index: {}]   ;;  %s1286_s7 = inlined_call_operand.vmem [shape: f32[1,128], index: 7, kind: input, shape index: {}]   ;;  %s1287_s8 = inlined_call_operand.vmem [shape: f32[1,128], index: 8, kind: input, shape index: {}]   ;;  %s1288_s9 = inlined_call_operand.hbm [shape: f32[128,128], index: 9, kind: input, shape index: {}]   ;;  %s1289_s10 = inlined_call_operand.vmem [shape: f32[1,128], index: 10, kind: input, shape index: {}]   ;;  %s1290_s11 = inlined_call_operand.hbm [shape: bf16[128,128], index: 11, kind: output, shape index: {}]  }
   0x1   :  { %16 = sst [smem:[#allocation4]] %s1279_s0 }
   0x2   :  { %18 = vsyncpa [#allocation7], 0 }
   0x3   :  { %19 = vsyncpa [#allocation10], 0 }
   0x4   :  { %20 = vsyncpa [#allocation13], 0  ;;  %s45_s21 = sshll.u32 %s1282_s3, 4  ;;  %s46_s21 = int_to_ptr.hbm [resolvable:$true] %s45_s21 }
   0x5   :  { %21 = vsyncpa [#allocation8], 0  ;;  %s1084_s22 = smov [#allocation9]   ;;  %s1085_s24 = smov 64  }
   0x6   :  { %s47_s23 = sshll.u32 %s1084_s22, 4  ;;  %s1086_s25 = smov 4   ;;  %s48_s23 = int_to_ptr.vmem [resolvable:$true] %s47_s23 }
   0x7   :  { %53 = dma.hbm_to_vmem [thread:$0]  %s46_s21, 1024, %s48_s23, [#allocation10], %s1085_s24, %s1085_s24, %s1086_s25  }
   0x8   :  { %s71_s27 = sshll.u32 %s1284_s5, 4  ;;  %s1087_s28 = smov [#allocation12]   ;;  %s72_s27 = int_to_ptr.hbm [resolvable:$true] %s71_s27 }
   0x9   :  { %s73_s29 = sshll.u32 %s1087_s28, 4  ;;  %s27_s30 = sld [smem:[#allocation4]]  ;;  %s74_s29 = int_to_ptr.vmem [resolvable:$true] %s73_s29 }
   0xa   :  { %s1088_s3 = smov 128   ;;  %s1089_s12 = smov 8  }
   0xb   :  { %79 = dma.hbm_to_vmem [thread:$0]  %s72_s27, 2048, %s74_s29, [#allocation13], %s1088_s3, %s1088_s3, %s1089_s12  }
   0xc   :  { %s1090_s13 = smov [#allocation6]   ;;  %s58_s17 = sshll.u32 %s1283_s4, 4  ;;  %s59_s17 = int_to_ptr.hbm [resolvable:$true] %s58_s17 }
   0xd   :  { %s34_s14 = sshll.u32 %s1090_s13, 4  ;;  %s90_s19 = sshll.u32 %s1288_s9, 4  ;;  %s35_s14 = int_to_ptr.vmem [resolvable:$true] %s34_s14  ;;  %s91_s19 = int_to_ptr.hbm [resolvable:$true] %s90_s19 }
   0xe   :  { %s1091_s21 = smov [#allocation11]   ;;  %s984_s15 = scalar_lea.hbm %s1281_s2, 32 }
   0xf   :  { %s730_s20 = sshll.u32 %s27_s30, 3  ;;  %s60_s22 = sshll.u32 %s1091_s21, 4  ;;  %s61_s22 = int_to_ptr.vmem [resolvable:$true] %s60_s22 }
  0x10   :  { %s31_s0 = scalar_lea.hbm %s1281_s2, %s730_s20 }
  0x11   :  { %s32_s27 = sshll.u32 %s31_s0, 4  ;;  %s33_s27 = int_to_ptr.hbm [resolvable:$true] %s32_s27 }
  0x12   :  { %s980_s28 = sshra.s32 %s33_s27, 4  ;;  %s981_s28 = int_to_ptr.hbm [resolvable:$true] %s980_s28 }
  0x13   :  { %s982_s4 = scalar_lea.hbm %s981_s28, 32  ;;  %p985_p1 = scmp.lt.s32.totalorder %s981_s28, %s1281_s2 }
  0x14   :  { %p983_p0 = scmp.ne.s32.totalorder %s981_s28, %s982_s4  ;;  %p986_p2 = scmp.lt.s32.totalorder %s984_s15, %s982_s4 }
  0x16   :  { %p987_p3 = por %p986_p2, %p985_p1 }
  0x18   :  { %p988_p4 = pnand %p987_p3, %p983_p0 }
  0x1a   :  { %991 = shalt.err (!%p988_p4)
}
  0x1b   :  { %40 = dma.hbm_to_vmem [thread:$0]  %s33_s27, 512, %s35_s14, [#allocation7], %s1088_s3, %s1088_s3, %s1089_s12  }
  0x1c   :  { %66 = dma.hbm_to_vmem [thread:$0]  %s59_s17, 1024, %s61_s22, [#allocation10], %s1085_s24, %s1085_s24, %s1086_s25  }
  0x1d   :  { %s1092_s16 = smov [#allocation14]  }
  0x1e   :  { %s92_s5 = sshll.u32 %s1092_s16, 4  ;;  %s93_s5 = int_to_ptr.vmem [resolvable:$true] %s92_s5 }
  0x1f   :  { %98 = dma.hbm_to_vmem [thread:$0]  %s91_s19, 2048, %s93_s5, [#allocation13], %s1088_s3, %s1088_s3, %s1089_s12  }
  0x20   :  { %1076 = dma.done.wait [#allocation7], 512  }
  0x21   :  { %1077 = vsyncadd [#allocation7], 4294966784 }
  0x22   :  { %1078 = dma.done.wait [#allocation10], 2048  }
  0x23   :  { %1079 = vsyncadd [#allocation10], 4294965248 }
  0x24   :  { %1080 = dma.done.wait [#allocation13], 4096  }
  0x25   :  { %1081 = vsyncadd [#allocation13], 4294963200  ;;  %v1093_v0 = vmov 0.0   ;;  %p732_p5 = scmp.le.s32.totalorder %s1280_s1, 0 }
  0x26   :  { %129 = vst [vmem:[#allocation2 + $0x30] sm:$0xff] %v1093_v0  ;;  %s197_s12 = sld [smem:[#allocation4]] (!%p732_p5) }
  0x27   :  { %130 = vst [vmem:[#allocation2] sm:$0xff] %v1093_v0 }
  0x28   :  { %131 = vst [vmem:[#allocation2 + $0x58] sm:$0xff] %v1093_v0 }
  0x29   :  { %132 = vst [vmem:[#allocation2 + $0x18] sm:$0xff] %v1093_v0 }
  0x2a   :  { %133 = vst [vmem:[#allocation2 + $0x50] sm:$0xff] %v1093_v0 }
  0x2b   :  { %134 = vst [vmem:[#allocation2 + $0x68] sm:$0xff] %v1093_v0 }
  0x2c   :  { %135 = vst [vmem:[#allocation2 + $0x8] sm:$0xff] %v1093_v0  ;;  %s733_s14 = sshll.u32 (!%p732_p5), %s197_s12, 7 }
  0x2d   :  { %136 = vst [vmem:[#allocation2 + $0x48] sm:$0xff] %v1093_v0  ;;  %s199_s17 = sshra.s32 (!%p732_p5), %s733_s14, 3 }
  0x2e   :  { %137 = vst [vmem:[#allocation2 + $0x40] sm:$0xff] %v1093_v0  ;;  %s734_s18 = sshll.u32 (!%p732_p5), %s199_s17, 2 }
  0x2f   :  { %138 = vst [vmem:[#allocation2 + $0x20] sm:$0xff] %v1093_v0  ;;  %s1197_s19 = scalar_lea.vmem (!%p732_p5), [#allocation9], %s734_s18 }
  0x30   :  { %139 = vst [vmem:[#allocation2 + $0x10] sm:$0xff] %v1093_v0 }
  0x31   :  { %140 = vst [vmem:[#allocation2 + $0x38] sm:$0xff] %v1093_v0  ;;  %149 = sbr.rel (%p732_p5) target bundleno = 247 (0xf7), region = 65 }
  0x32   :  { %141 = vst [vmem:[#allocation2 + $0x60] sm:$0xff] %v1093_v0 }
  0x33   :  { %142 = vst [vmem:[#allocation2 + $0x70] sm:$0xff] %v1093_v0 }
  0x34   :  { %143 = vst [vmem:[#allocation2 + $0x78] sm:$0xff] %v1093_v0 }
  0x35   :  { %144 = vst [vmem:[#allocation2 + $0x28] sm:$0xff] %v1093_v0 }
  0x36   :  { %v774_v1 = vld [vmem:[%s1197_s19 + $0x38] sm:$0xff]  ;;  %v773_v2 = vld [vmem:[%s1197_s19 + $0x30] sm:$0xff]  ;;  %v772_v3 = vld [vmem:[%s1197_s19 + $0x28] sm:$0xff] }
  0x37   :  { %283 = vmatpush.bf16.msra.mxu0 %v774_v1  ;;  %861 = vmatpush.bf16.msra.mxu1 %v774_v1  ;;  %v771_v4 = vld [vmem:[%s1197_s19 + $0x20] sm:$0xff]  ;;  %v770_v5 = vld [vmem:[%s1197_s19 + $0x18] sm:$0xff]  ;;  %v769_v6 = vld [vmem:[%s1197_s19 + $0x10] sm:$0xff] }
  0x38   :  { %862 = vmatpush.bf16.msra.mxu2 %v774_v1  ;;  %863 = vmatpush.bf16.msra.mxu3 %v774_v1  ;;  %v150_v7 = vld [vmem:[#allocation6] sm:$0xff]  ;;  %v151_v8 = vld [vmem:[#allocation6 + $0x8] sm:$0xff]  ;;  %v152_v9 = vld [vmem:[#allocation6 + $0x10] sm:$0xff] }
  0x39   :  { %v153_v10 = vld [vmem:[#allocation6 + $0x18] sm:$0xff]  ;;  %v154_v11 = vunpack.c.0.s8 %v150_v7  ;;  %v155_v12 = vunpack.c.1.s8 %v150_v7  ;;  %v158_v13 = vunpack.c.0.s8 %v151_v8  ;;  %v159_v14 = vunpack.c.1.s8 %v151_v8  ;;  %v768_v15 = vld [vmem:[%s1197_s19 + $0x8] sm:$0xff]  ;;  %v767_v24 = vld [vmem:[%s1197_s19] sm:$0xff] }
  0x3a   :  { %v162_v16 = vunpack.c.0.s8 %v152_v9  ;;  %v163_v17 = vunpack.c.1.s8 %v152_v9  ;;  %v166_v18 = vunpack.c.0.s8 %v153_v10  ;;  %v167_v19 = vunpack.c.1.s8 %v153_v10  ;;  %v219_v53 = vld [vmem:[#allocation2 + $0x30] sm:$0xff]  ;;  %v227_v59 = vld [vmem:[#allocation2 + $0x40] sm:$0xff]  ;;  %v224_v62 = vld [vmem:[#allocation2 + $0x68] sm:$0xff] }
  0x3b   :  { %284 = vmatpush.bf16.msra.mxu0 %v773_v2  ;;  %864 = vmatpush.bf16.msra.mxu1 %v773_v2  ;;  %v170_v20 = vcvt.s32.f32 %v154_v11  ;;  %v171_v21 = vcvt.s32.f32 %v155_v12  ;;  %v174_v22 = vcvt.s32.f32 %v158_v13  ;;  %v175_v23 = vcvt.s32.f32 %v159_v14  ;;  %v223_v54 = vld [vmem:[#allocation2 + $0x50] sm:$0xff]  ;;  %v231_v60 = vld [vmem:[#allocation2 + $0x60] sm:$0xff] }
  0x3c   :  { %865 = vmatpush.bf16.msra.mxu2 %v773_v2  ;;  %866 = vmatpush.bf16.msra.mxu3 %v773_v2  ;;  %v178_v25 = vcvt.s32.f32 %v162_v16  ;;  %v179_v26 = vcvt.s32.f32 %v163_v17  ;;  %v182_v27 = vcvt.s32.f32 %v166_v18  ;;  %v183_v28 = vcvt.s32.f32 %v167_v19  ;;  %v220_v61 = vld [vmem:[#allocation2] sm:$0xff]  ;;  %v229_v19 = vld [vmem:[#allocation2 + $0x10] sm:$0xff] }
  0x3d   :  { %v186_v29 = vpack.c.bf16 %v171_v21, %v170_v20  ;;  %v188_v30 = vpack.c.bf16 %v175_v23, %v174_v22  ;;  %v156_v33 = vunpack.c.2.s8 %v150_v7  ;;  %v157_v34 = vunpack.c.3.s8 %v150_v7  ;;  %v228_v7 = vld [vmem:[#allocation2 + $0x20] sm:$0xff]  ;;  %v233_v20 = vld [vmem:[#allocation2 + $0x78] sm:$0xff]  ;;  %v226_v22 = vld [vmem:[#allocation2 + $0x48] sm:$0xff] }
  0x3e   :  { %v190_v31 = vpack.c.bf16 %v179_v26, %v178_v25  ;;  %v192_v32 = vpack.c.bf16 %v183_v28, %v182_v27  ;;  %v160_v35 = vunpack.c.2.s8 %v151_v8  ;;  %v161_v36 = vunpack.c.3.s8 %v151_v8  ;;  %v232_v8 = vld [vmem:[#allocation2 + $0x70] sm:$0xff]  ;;  %v222_v21 = vld [vmem:[#allocation2 + $0x18] sm:$0xff] }
  0x3f   :  { %285 = vmatpush.bf16.msra.mxu0 %v772_v3  ;;  %867 = vmatpush.bf16.msra.mxu1 %v772_v3  ;;  %v164_v37 = vunpack.c.2.s8 %v152_v9  ;;  %v165_v38 = vunpack.c.3.s8 %v152_v9  ;;  %v168_v39 = vunpack.c.2.s8 %v153_v10  ;;  %v169_v40 = vunpack.c.3.s8 %v153_v10  ;;  %v221_v9 = vld [vmem:[#allocation2 + $0x58] sm:$0xff]  ;;  %v225_v10 = vld [vmem:[#allocation2 + $0x8] sm:$0xff] }
  0x40   :  { %868 = vmatpush.bf16.msra.mxu2 %v772_v3  ;;  %869 = vmatpush.bf16.msra.mxu3 %v772_v3  ;;  %v172_v41 = vcvt.s32.f32 %v156_v33  ;;  %v173_v42 = vcvt.s32.f32 %v157_v34  ;;  %v176_v43 = vcvt.s32.f32 %v160_v35  ;;  %v177_v44 = vcvt.s32.f32 %v161_v36 }
  0x41   :  { %v180_v45 = vcvt.s32.f32 %v164_v37  ;;  %v181_v46 = vcvt.s32.f32 %v165_v38  ;;  %v184_v47 = vcvt.s32.f32 %v168_v39  ;;  %v185_v48 = vcvt.s32.f32 %v169_v40 }
  0x42   :  { %v187_v49 = vpack.c.bf16 %v173_v42, %v172_v41  ;;  %v189_v50 = vpack.c.bf16 %v177_v44, %v176_v43 }
  0x43   :  { %286 = vmatpush.bf16.msra.mxu0 %v771_v4  ;;  %870 = vmatpush.bf16.msra.mxu1 %v771_v4  ;;  %v191_v51 = vpack.c.bf16 %v181_v46, %v180_v45  ;;  %v193_v52 = vpack.c.bf16 %v185_v48, %v184_v47 }
  0x44   :  { %871 = vmatpush.bf16.msra.mxu2 %v771_v4  ;;  %872 = vmatpush.bf16.msra.mxu3 %v771_v4 }
  0x47   :  { %287 = vmatpush.bf16.msra.mxu0 %v770_v5  ;;  %873 = vmatpush.bf16.msra.mxu1 %v770_v5 }
  0x48   :  { %874 = vmatpush.bf16.msra.mxu2 %v770_v5  ;;  %875 = vmatpush.bf16.msra.mxu3 %v770_v5 }
  0x4b   :  { %288 = vmatpush.bf16.msra.mxu0 %v769_v6  ;;  %876 = vmatpush.bf16.msra.mxu1 %v769_v6 }
  0x4c   :  { %877 = vmatpush.bf16.msra.mxu2 %v769_v6  ;;  %878 = vmatpush.bf16.msra.mxu3 %v769_v6 }
  0x4f   :  { %289 = vmatpush.bf16.msra.mxu0 %v768_v15  ;;  %879 = vmatpush.bf16.msra.mxu1 %v768_v15 }
  0x50   :  { %880 = vmatpush.bf16.msra.mxu2 %v768_v15  ;;  %881 = vmatpush.bf16.msra.mxu3 %v768_v15 }
  0x53   :  { %290 = vmatpush.bf16.msra.mxu0 %v767_v24  ;;  %882 = vmatpush.bf16.msra.mxu1 %v767_v24 }
  0x54   :  { %883 = vmatpush.bf16.msra.mxu2 %v767_v24  ;;  %884 = vmatpush.bf16.msra.mxu3 %v767_v24 }
  0x56   :  { %291 = vmatmul.bf16.vlgmr.msra.gmra.mxu0 %v186_v29  ;;  %301 = vmatmul.bf16.vlgmr.msra.gmra.mxu1 %v188_v30 }
  0x57   :  { %311 = vmatmul.bf16.vlgmr.msra.gmra.mxu2 %v190_v31  ;;  %321 = vmatmul.bf16.vlgmr.msra.gmra.mxu3 %v192_v32  ;;  %v230_v31 = vld [vmem:[#allocation2 + $0x38] sm:$0xff]  ;;  %v234_v32 = vld [vmem:[#allocation2 + $0x28] sm:$0xff] }
  0x66   :  { %296 = vmatmul.bf16.gmra.mxu0 %v187_v49  ;;  %306 = vmatmul.bf16.gmra.mxu1 %v189_v50 }
  0x67   :  { %316 = vmatmul.bf16.gmra.mxu2 %v191_v51  ;;  %326 = vmatmul.bf16.gmra.mxu3 %v193_v52 }
  0xd3   :  { %v292_v55 = vpop.f32.mrf.mxu0  ;;  %v302_v56 = vpop.f32.mrf.mxu1 }
  0xd4   :  { %v332_v57 = vadd.f32 %v292_v55, %v219_v53  ;;  %v336_v58 = vadd.f32 %v302_v56, %v223_v54 }
  0xd6   :  { %348 = vst [vmem:[#allocation2 + $0x30] sm:$0xff] %v332_v57 }
  0xd7   :  { %352 = vst [vmem:[#allocation2 + $0x50] sm:$0xff] %v336_v58 }
  0xda   :  { %v312_v63 = vpop.f32.mrf.mxu2  ;;  %v322_v0 = vpop.f32.mrf.mxu3 }
  0xdb   :  { %v340_v1 = vadd.f32 %v312_v63, %v227_v59  ;;  %v344_v2 = vadd.f32 %v322_v0, %v231_v60  ;;  %v294_v3 = vpop.f32.mrf.mxu0  ;;  %v304_v4 = vpop.f32.mrf.mxu1 }
  0xdc   :  { %v333_v5 = vadd.f32 %v294_v3, %v220_v61  ;;  %v337_v6 = vadd.f32 %v304_v4, %v224_v62 }
  0xdd   :  { %356 = vst [vmem:[#allocation2 + $0x40] sm:$0xff] %v340_v1 }
  0xde   :  { %360 = vst [vmem:[#allocation2 + $0x60] sm:$0xff] %v344_v2 }
  0xdf   :  { %349 = vst [vmem:[#allocation2] sm:$0xff] %v333_v5 }
  0xe0   :  { %353 = vst [vmem:[#allocation2 + $0x68] sm:$0xff] %v337_v6 }
  0xe2   :  { %v314_v11 = vpop.f32.mrf.mxu2  ;;  %v324_v12 = vpop.f32.mrf.mxu3 }
  0xe3   :  { %v341_v13 = vadd.f32 %v314_v11, %v228_v7  ;;  %v345_v14 = vadd.f32 %v324_v12, %v232_v8  ;;  %v297_v15 = vpop.f32.mrf.mxu0  ;;  %v307_v16 = vpop.f32.mrf.mxu1 }
  0xe4   :  { %v334_v17 = vadd.f32 %v297_v15, %v221_v9  ;;  %v338_v18 = vadd.f32 %v307_v16, %v225_v10 }
  0xe5   :  { %357 = vst [vmem:[#allocation2 + $0x20] sm:$0xff] %v341_v13 }
  0xe6   :  { %361 = vst [vmem:[#allocation2 + $0x70] sm:$0xff] %v345_v14 }
  0xe7   :  { %350 = vst [vmem:[#allocation2 + $0x58] sm:$0xff] %v334_v17 }
  0xe8   :  { %354 = vst [vmem:[#allocation2 + $0x8] sm:$0xff] %v338_v18 }
  0xea   :  { %v317_v23 = vpop.f32.mrf.mxu2  ;;  %v327_v24 = vpop.f32.mrf.mxu3 }
  0xeb   :  { %v342_v25 = vadd.f32 %v317_v23, %v229_v19  ;;  %v346_v26 = vadd.f32 %v327_v24, %v233_v20  ;;  %v299_v27 = vpop.f32.mrf.mxu0  ;;  %v309_v28 = vpop.f32.mrf.mxu1 }
  0xec   :  { %v335_v29 = vadd.f32 %v299_v27, %v222_v21  ;;  %v339_v30 = vadd.f32 %v309_v28, %v226_v22 }
  0xed   :  { %358 = vst [vmem:[#allocation2 + $0x10] sm:$0xff] %v342_v25 }
  0xee   :  { %362 = vst [vmem:[#allocation2 + $0x78] sm:$0xff] %v346_v26 }
  0xef   :  { %351 = vst [vmem:[#allocation2 + $0x18] sm:$0xff] %v335_v29 }
  0xf0   :  { %355 = vst [vmem:[#allocation2 + $0x48] sm:$0xff] %v339_v30 }
  0xf2   :  { %v319_v33 = vpop.f32.mrf.mxu2  ;;  %v329_v34 = vpop.f32.mrf.mxu3 }
  0xf3   :  { %v343_v35 = vadd.f32 %v319_v33, %v230_v31  ;;  %v347_v36 = vadd.f32 %v329_v34, %v234_v32 }
  0xf5   :  { %359 = vst [vmem:[#allocation2 + $0x38] sm:$0xff] %v343_v35 }
  0xf6   :  { %363 = vst [vmem:[#allocation2 + $0x28] sm:$0xff] %v347_v36 }
  0xf7 PF:  { %v446_v37 = vld [vmem:[#allocation12 + $0x78] sm:$0xff]  ;;  %v445_v38 = vld [vmem:[#allocation12 + $0x70] sm:$0xff]  ;;  %v444_v39 = vld [vmem:[#allocation12 + $0x68] sm:$0xff]  ;;  %s711_s28 = sshll.u32 %s1290_s11, 4  ;;  %s712_s28 = int_to_ptr.hbm [resolvable:$true] %s711_s28 }
  0xf8   :  { %885 = vmatpush.msra.mxu2 %v446_v37  ;;  %451 = vmatpush.msra.mxu0 %v446_v37  ;;  %v443_v40 = vld [vmem:[#allocation12 + $0x60] sm:$0xff]  ;;  %v442_v41 = vld [vmem:[#allocation12 + $0x58] sm:$0xff]  ;;  %v441_v42 = vld [vmem:[#allocation12 + $0x50] sm:$0xff] }
  0xf9   :  { %v440_v43 = vld [vmem:[#allocation12 + $0x48] sm:$0xff]  ;;  %v439_v44 = vld [vmem:[#allocation12 + $0x40] sm:$0xff]  ;;  %v438_v45 = vld [vmem:[#allocation12 + $0x38] sm:$0xff] }
  0xfa   :  { %886 = vmatpush.msra.mxu2 %v445_v38  ;;  %452 = vmatpush.msra.mxu0 %v445_v38  ;;  %v437_v46 = vld [vmem:[#allocation12 + $0x30] sm:$0xff]  ;;  %v436_v47 = vld [vmem:[#allocation12 + $0x28] sm:$0xff]  ;;  %v435_v48 = vld [vmem:[#allocation12 + $0x20] sm:$0xff] }
  0xfb   :  { %v850_v49 = vld [vmem:[#allocation11 + $0x20] sm:$0xff]   ;;  %v434_v51 = vld [vmem:[#allocation12 + $0x18] sm:$0xff]  ;;  %v433_v52 = vld [vmem:[#allocation12 + $0x10] sm:$0xff] }
  0xfc   :  { %887 = vmatpush.msra.mxu2 %v444_v39  ;;  %453 = vmatpush.msra.mxu0 %v444_v39  ;;  %v776_v50 = vld [vmem:[#allocation11] sm:$0xff]   ;;  %v793_v53 = vunpack.c.l.bf16 %v850_v49  ;;  %v367_v56 = vld [vmem:[#allocation2 + $0x30] sm:$0xff]  ;;  %v432_v57 = vld [vmem:[#allocation12 + $0x8] sm:$0xff]  ;;  %v794_v61 = vunpack.c.h.bf16 %v850_v49 }
  0xfd   :  { %v777_v54 = vunpack.c.l.bf16 %v776_v50  ;;  %v375_v55 = vld [vmem:[#allocation2 + $0x40] sm:$0xff]  ;;  %v778_v62 = vunpack.c.h.bf16 %v776_v50  ;;  %v851_v3 = vld [vmem:[#allocation11 + $0x28] sm:$0xff]   ;;  %v377_v7 = vld [vmem:[#allocation2 + $0x10] sm:$0xff] }
  0xfe   :  { %888 = vmatpush.msra.mxu2 %v443_v40  ;;  %454 = vmatpush.msra.mxu0 %v443_v40  ;;  %v431_v58 = vld [vmem:[#allocation12] sm:$0xff]  ;;  %v423_v59 = vadd.f32 %v793_v53, %v375_v55  ;;  %v847_v4 = vld [vmem:[#allocation11 + $0x8] sm:$0xff]   ;;  %v797_v5 = vunpack.c.l.bf16 %v851_v3  ;;  %v369_v8 = vld [vmem:[#allocation2 + $0x58] sm:$0xff]  ;;  %v798_v11 = vunpack.c.h.bf16 %v851_v3 }
  0xff   :  { %v415_v60 = vadd.f32 %v777_v54, %v367_v56  ;;  %v376_v63 = vld [vmem:[#allocation2 + $0x20] sm:$0xff]  ;;  %v781_v6 = vunpack.c.l.bf16 %v847_v4  ;;  %v782_v12 = vunpack.c.h.bf16 %v847_v4  ;;  %v378_v13 = vld [vmem:[#allocation2 + $0x38] sm:$0xff]  ;;  %v852_v17 = vld [vmem:[#allocation11 + $0x30] sm:$0xff]  }
 0x100   :  { %889 = vmatpush.msra.mxu2 %v442_v41  ;;  %455 = vmatpush.msra.mxu0 %v442_v41  ;;  %v368_v0 = vld [vmem:[#allocation2] sm:$0xff]  ;;  %v424_v1 = vadd.f32 %v794_v61, %v376_v63  ;;  %v425_v9 = vadd.f32 %v797_v5, %v377_v7  ;;  %v370_v14 = vld [vmem:[#allocation2 + $0x18] sm:$0xff]  ;;  %v426_v15 = vadd.f32 %v798_v11, %v378_v13  ;;  %v848_v18 = vld [vmem:[#allocation11 + $0x10] sm:$0xff]   ;;  %v801_v19 = vunpack.c.l.bf16 %v852_v17 }
 0x101   :  { %v416_v2 = vadd.f32 %v778_v62, %v368_v0  ;;  %v417_v10 = vadd.f32 %v781_v6, %v369_v8  ;;  %v418_v16 = vadd.f32 %v782_v12, %v370_v14  ;;  %v785_v20 = vunpack.c.l.bf16 %v848_v18  ;;  %v587_v21 = vld [vmem:[#allocation14 + $0x78] sm:$0xff]  ;;  %v586_v22 = vld [vmem:[#allocation14 + $0x70] sm:$0xff]  ;;  %v379_v23 = vld [vmem:[#allocation2 + $0x60] sm:$0xff] }
 0x102   :  { %890 = vmatpush.msra.mxu2 %v441_v42  ;;  %456 = vmatpush.msra.mxu0 %v441_v42  ;;  %v371_v24 = vld [vmem:[#allocation2 + $0x50] sm:$0xff]  ;;  %v585_v25 = vld [vmem:[#allocation14 + $0x68] sm:$0xff]  ;;  %v427_v26 = vadd.f32 %v801_v19, %v379_v23  ;;  %v584_v28 = vld [vmem:[#allocation14 + $0x60] sm:$0xff]  ;;  %v802_v30 = vunpack.c.h.bf16 %v852_v17  ;;  %v786_v31 = vunpack.c.h.bf16 %v848_v18 }
 0x103   :  { %592 = vmatpush.msra.mxu1 %v587_v21  ;;  %901 = vmatpush.msra.mxu3 %v587_v21  ;;  %v419_v27 = vadd.f32 %v785_v20, %v371_v24  ;;  %v583_v29 = vld [vmem:[#allocation14 + $0x58] sm:$0xff]  ;;  %v582_v32 = vld [vmem:[#allocation14 + $0x50] sm:$0xff]  ;;  %v372_v34 = vld [vmem:[#allocation2 + $0x68] sm:$0xff] }
 0x104   :  { %891 = vmatpush.msra.mxu2 %v440_v43  ;;  %457 = vmatpush.msra.mxu0 %v440_v43  ;;  %v380_v33 = vld [vmem:[#allocation2 + $0x70] sm:$0xff]  ;;  %v581_v35 = vld [vmem:[#allocation14 + $0x48] sm:$0xff]  ;;  %v420_v37 = vadd.f32 %v786_v31, %v372_v34  ;;  %v580_v38 = vld [vmem:[#allocation14 + $0x40] sm:$0xff] }
 0x105   :  { %593 = vmatpush.msra.mxu1 %v586_v22  ;;  %902 = vmatpush.msra.mxu3 %v586_v22  ;;  %v428_v36 = vadd.f32 %v802_v30, %v380_v33  ;;  %v853_v39 = vld [vmem:[#allocation11 + $0x38] sm:$0xff]   ;;  %v374_v53 = vld [vmem:[#allocation2 + $0x48] sm:$0xff]  ;;  %v576_v56 = vld [vmem:[#allocation14 + $0x20] sm:$0xff] }
 0x106   :  { %892 = vmatpush.msra.mxu2 %v439_v44  ;;  %458 = vmatpush.msra.mxu0 %v439_v44  ;;  %v849_v40 = vld [vmem:[#allocation11 + $0x18] sm:$0xff]   ;;  %v805_v42 = vunpack.c.l.bf16 %v853_v39  ;;  %v578_v44 = vld [vmem:[#allocation14 + $0x30] sm:$0xff]  ;;  %v806_v50 = vunpack.c.h.bf16 %v853_v39  ;;  %v1210_v61 = vld [vmem:[%s1285_s6] ss:$0 sm:$0xff] }
 0x107   :  { %594 = vmatpush.msra.mxu1 %v585_v25  ;;  %903 = vmatpush.msra.mxu3 %v585_v25  ;;  %v579_v41 = vld [vmem:[#allocation14 + $0x38] sm:$0xff]  ;;  %v789_v43 = vunpack.c.l.bf16 %v849_v40  ;;  %v1215_v62 = vld [vmem:[%s1286_s7] ss:$0 sm:$0xff] }
 0x108   :  { %893 = vmatpush.msra.mxu2 %v438_v45  ;;  %459 = vmatpush.msra.mxu0 %v438_v45  ;;  %v381_v45 = vld [vmem:[#allocation2 + $0x78] sm:$0xff] }
 0x109   :  { %595 = vmatpush.msra.mxu1 %v584_v28  ;;  %904 = vmatpush.msra.mxu3 %v584_v28 }
 0x10a   :  { %894 = vmatpush.msra.mxu2 %v437_v46  ;;  %460 = vmatpush.msra.mxu0 %v437_v46  ;;  %v373_v46 = vld [vmem:[#allocation2 + $0x8] sm:$0xff] }
 0x10b   :  { %596 = vmatpush.msra.mxu1 %v583_v29  ;;  %905 = vmatpush.msra.mxu3 %v583_v29  ;;  %v421_v49 = vadd.f32 %v789_v43, %v373_v46 }
 0x10c   :  { %895 = vmatpush.msra.mxu2 %v436_v47  ;;  %461 = vmatpush.msra.mxu0 %v436_v47  ;;  %v577_v47 = vld [vmem:[#allocation14 + $0x28] sm:$0xff] }
 0x10d   :  { %597 = vmatpush.msra.mxu1 %v582_v32  ;;  %906 = vmatpush.msra.mxu3 %v582_v32 }
 0x10e   :  { %896 = vmatpush.msra.mxu2 %v435_v48  ;;  %462 = vmatpush.msra.mxu0 %v435_v48  ;;  %v429_v48 = vadd.f32 %v805_v42, %v381_v45 }
 0x10f   :  { %598 = vmatpush.msra.mxu1 %v581_v35  ;;  %907 = vmatpush.msra.mxu3 %v581_v35 }
 0x110   :  { %897 = vmatpush.msra.mxu2 %v434_v51  ;;  %463 = vmatpush.msra.mxu0 %v434_v51  ;;  %v790_v51 = vunpack.c.h.bf16 %v849_v40 }
 0x111   :  { %599 = vmatpush.msra.mxu1 %v580_v38  ;;  %908 = vmatpush.msra.mxu3 %v580_v38 }
 0x112   :  { %898 = vmatpush.msra.mxu2 %v433_v52  ;;  %464 = vmatpush.msra.mxu0 %v433_v52  ;;  %v382_v52 = vld [vmem:[#allocation2 + $0x28] sm:$0xff]  ;;  %v422_v55 = vadd.f32 %v790_v51, %v374_v53 }
 0x113   :  { %600 = vmatpush.msra.mxu1 %v579_v41  ;;  %909 = vmatpush.msra.mxu3 %v579_v41  ;;  %v430_v54 = vadd.f32 %v806_v50, %v382_v52 }
 0x114   :  { %899 = vmatpush.msra.mxu2 %v432_v57  ;;  %465 = vmatpush.msra.mxu0 %v432_v57  ;;  %v575_v57 = vld [vmem:[#allocation14 + $0x18] sm:$0xff] }
 0x115   :  { %601 = vmatpush.msra.mxu1 %v578_v44  ;;  %910 = vmatpush.msra.mxu3 %v578_v44 }
 0x116   :  { %900 = vmatpush.msra.mxu2 %v431_v58  ;;  %466 = vmatpush.msra.mxu0 %v431_v58  ;;  %v574_v58 = vld [vmem:[#allocation14 + $0x10] sm:$0xff] }
 0x117   :  { %491 = vmatmul.f32.vlgmr.msra.gmra.mxu2 %v423_v59  ;;  %467 = vmatmul.f32.vlgmr.msra.gmra.mxu0 %v415_v60  ;;  %v573_v59 = vld [vmem:[#allocation14 + $0x8] sm:$0xff]  ;;  %v572_v60 = vld [vmem:[#allocation14] sm:$0xff] }
 0x118   :  { %602 = vmatpush.msra.mxu1 %v577_v47  ;;  %911 = vmatpush.msra.mxu3 %v577_v47 }
 0x11a   :  { %603 = vmatpush.msra.mxu1 %v576_v56  ;;  %912 = vmatpush.msra.mxu3 %v576_v56 }
 0x11c   :  { %604 = vmatpush.msra.mxu1 %v575_v57  ;;  %913 = vmatpush.msra.mxu3 %v575_v57 }
 0x11e   :  { %605 = vmatpush.msra.mxu1 %v574_v58  ;;  %914 = vmatpush.msra.mxu3 %v574_v58 }
 0x11f   :  { %494 = vmatmul.f32.gmra.mxu2 %v424_v1  ;;  %470 = vmatmul.f32.gmra.mxu0 %v416_v2  ;;  %v1221_v1 = vld [vmem:[%s1287_s8] ss:$0 sm:$0xff]  ;;  %s1094_s8 = smov [#allocation15]  }
 0x120   :  { %606 = vmatpush.msra.mxu1 %v573_v59  ;;  %915 = vmatpush.msra.mxu3 %v573_v59 }
 0x122   :  { %607 = vmatpush.msra.mxu1 %v572_v60  ;;  %916 = vmatpush.msra.mxu3 %v572_v60 }
 0x127   :  { %497 = vmatmul.f32.gmra.mxu2 %v425_v9  ;;  %473 = vmatmul.f32.gmra.mxu0 %v417_v10 }
 0x12f   :  { %500 = vmatmul.f32.gmra.mxu2 %v426_v15  ;;  %476 = vmatmul.f32.gmra.mxu0 %v418_v16 }
 0x137   :  { %503 = vmatmul.f32.gmra.mxu2 %v427_v26  ;;  %479 = vmatmul.f32.gmra.mxu0 %v419_v27 }
 0x13f   :  { %506 = vmatmul.f32.gmra.mxu2 %v428_v36  ;;  %482 = vmatmul.f32.gmra.mxu0 %v420_v37 }
 0x147   :  { %509 = vmatmul.f32.gmra.mxu2 %v429_v48  ;;  %485 = vmatmul.f32.gmra.mxu0 %v421_v49 }
 0x14f   :  { %512 = vmatmul.f32.gmra.mxu2 %v430_v54  ;;  %488 = vmatmul.f32.gmra.mxu0 %v422_v55 }
 0x194   :  { %v468_v63 = vpop.f32.mrf.mxu0 }
 0x195   :  { %v469_v0 = vadd.f32 %v1210_v61, %v468_v63 }
 0x197   :  { %v520_v2 = vmul.f32 %v1215_v62, %v469_v0 }
 0x199   :  { %v540_v3 = vadd.f32 %v1221_v1, %v520_v2 }
 0x19a   :  { %v492_v4 = vpop.f32.mrf.mxu2 }
 0x19b   :  { %v493_v5 = vadd.f32 %v1210_v61, %v492_v4  ;;  %v556_v6 = vmax.f32 %v540_v3, 0.0 }
 0x19c   :  { %v471_v7 = vpop.f32.mrf.mxu0 }
 0x19d   :  { %v528_v8 = vmul.f32 %v1215_v62, %v493_v5  ;;  %v472_v9 = vadd.f32 %v1210_v61, %v471_v7  ;;  %608 = vmatmul.f32.vlgmr.msra.gmra.mxu1 %v556_v6 }
 0x19f   :  { %v521_v10 = vmul.f32 %v1215_v62, %v472_v9  ;;  %v548_v11 = vadd.f32 %v1221_v1, %v528_v8 }
 0x1a1   :  { %v564_v12 = vmax.f32 %v548_v11, 0.0  ;;  %v541_v13 = vadd.f32 %v1221_v1, %v521_v10 }
 0x1a2   :  { %v495_v14 = vpop.f32.mrf.mxu2 }
 0x1a3   :  { %v496_v15 = vadd.f32 %v1210_v61, %v495_v14  ;;  %632 = vmatmul.f32.vlgmr.msra.gmra.mxu3 %v564_v12  ;;  %v557_v16 = vmax.f32 %v541_v13, 0.0 }
 0x1a4   :  { %v474_v17 = vpop.f32.mrf.mxu0 }
 0x1a5   :  { %v529_v18 = vmul.f32 %v1215_v62, %v496_v15  ;;  %v475_v19 = vadd.f32 %v1210_v61, %v474_v17  ;;  %611 = vmatmul.f32.gmra.mxu1 %v557_v16 }
 0x1a7   :  { %v522_v20 = vmul.f32 %v1215_v62, %v475_v19  ;;  %v549_v21 = vadd.f32 %v1221_v1, %v529_v18 }
 0x1a9   :  { %v565_v22 = vmax.f32 %v549_v21, 0.0  ;;  %v542_v23 = vadd.f32 %v1221_v1, %v522_v20  ;;  %v931_v20 = vld [vmem:[%s1289_s10] ss:$0 sm:$0xff]  ;;  %s709_s10 = sshll.u32 %s1094_s8, 4  ;;  %s710_s10 = int_to_ptr.vmem [resolvable:$true] %s709_s10 }
 0x1aa   :  { %v498_v24 = vpop.f32.mrf.mxu2 }
 0x1ab   :  { %v499_v25 = vadd.f32 %v1210_v61, %v498_v24  ;;  %635 = vmatmul.f32.gmra.mxu3 %v565_v22  ;;  %v558_v26 = vmax.f32 %v542_v23, 0.0 }
 0x1ac   :  { %v477_v27 = vpop.f32.mrf.mxu0 }
 0x1ad   :  { %v530_v28 = vmul.f32 %v1215_v62, %v499_v25  ;;  %v478_v29 = vadd.f32 %v1210_v61, %v477_v27  ;;  %614 = vmatmul.f32.gmra.mxu1 %v558_v26 }
 0x1af   :  { %v523_v30 = vmul.f32 %v1215_v62, %v478_v29  ;;  %v550_v31 = vadd.f32 %v1221_v1, %v530_v28 }
 0x1b1   :  { %v566_v32 = vmax.f32 %v550_v31, 0.0  ;;  %v543_v33 = vadd.f32 %v1221_v1, %v523_v30 }
 0x1b2   :  { %v501_v34 = vpop.f32.mrf.mxu2 }
 0x1b3   :  { %v502_v35 = vadd.f32 %v1210_v61, %v501_v34  ;;  %638 = vmatmul.f32.gmra.mxu3 %v566_v32  ;;  %v559_v36 = vmax.f32 %v543_v33, 0.0 }
 0x1b4   :  { %v480_v37 = vpop.f32.mrf.mxu0 }
 0x1b5   :  { %v531_v38 = vmul.f32 %v1215_v62, %v502_v35  ;;  %v481_v39 = vadd.f32 %v1210_v61, %v480_v37  ;;  %617 = vmatmul.f32.gmra.mxu1 %v559_v36 }
 0x1b7   :  { %v524_v40 = vmul.f32 %v1215_v62, %v481_v39  ;;  %v551_v41 = vadd.f32 %v1221_v1, %v531_v38 }
 0x1b9   :  { %v567_v42 = vmax.f32 %v551_v41, 0.0  ;;  %v544_v43 = vadd.f32 %v1221_v1, %v524_v40 }
 0x1ba   :  { %v504_v44 = vpop.f32.mrf.mxu2 }
 0x1bb   :  { %v505_v45 = vadd.f32 %v1210_v61, %v504_v44  ;;  %641 = vmatmul.f32.gmra.mxu3 %v567_v42  ;;  %v560_v46 = vmax.f32 %v544_v43, 0.0 }
 0x1bc   :  { %v483_v47 = vpop.f32.mrf.mxu0 }
 0x1bd   :  { %v532_v48 = vmul.f32 %v1215_v62, %v505_v45  ;;  %v484_v49 = vadd.f32 %v1210_v61, %v483_v47  ;;  %620 = vmatmul.f32.gmra.mxu1 %v560_v46 }
 0x1bf   :  { %v525_v50 = vmul.f32 %v1215_v62, %v484_v49  ;;  %v552_v51 = vadd.f32 %v1221_v1, %v532_v48 }
 0x1c1   :  { %v568_v52 = vmax.f32 %v552_v51, 0.0  ;;  %v545_v53 = vadd.f32 %v1221_v1, %v525_v50 }
 0x1c2   :  { %v507_v54 = vpop.f32.mrf.mxu2 }
 0x1c3   :  { %v508_v55 = vadd.f32 %v1210_v61, %v507_v54  ;;  %644 = vmatmul.f32.gmra.mxu3 %v568_v52  ;;  %v561_v56 = vmax.f32 %v545_v53, 0.0 }
 0x1c4   :  { %v486_v57 = vpop.f32.mrf.mxu0 }
 0x1c5   :  { %v533_v58 = vmul.f32 %v1215_v62, %v508_v55  ;;  %v487_v59 = vadd.f32 %v1210_v61, %v486_v57  ;;  %623 = vmatmul.f32.gmra.mxu1 %v561_v56 }
 0x1c7   :  { %v526_v60 = vmul.f32 %v1215_v62, %v487_v59  ;;  %v553_v63 = vadd.f32 %v1221_v1, %v533_v58 }
 0x1c9   :  { %v569_v0 = vmax.f32 %v553_v63, 0.0  ;;  %v546_v2 = vadd.f32 %v1221_v1, %v526_v60 }
 0x1ca   :  { %v510_v3 = vpop.f32.mrf.mxu2 }
 0x1cb   :  { %v511_v4 = vadd.f32 %v1210_v61, %v510_v3  ;;  %647 = vmatmul.f32.gmra.mxu3 %v569_v0  ;;  %v562_v5 = vmax.f32 %v546_v2, 0.0 }
 0x1cc   :  { %v489_v6 = vpop.f32.mrf.mxu0 }
 0x1cd   :  { %v534_v7 = vmul.f32 %v1215_v62, %v511_v4  ;;  %v490_v8 = vadd.f32 %v1210_v61, %v489_v6  ;;  %626 = vmatmul.f32.gmra.mxu1 %v562_v5 }
 0x1cf   :  { %v527_v9 = vmul.f32 %v1215_v62, %v490_v8  ;;  %v554_v10 = vadd.f32 %v1221_v1, %v534_v7 }
 0x1d1   :  { %v570_v11 = vmax.f32 %v554_v10, 0.0  ;;  %v547_v12 = vadd.f32 %v1221_v1, %v527_v9 }
 0x1d2   :  { %v513_v13 = vpop.f32.mrf.mxu2 }
 0x1d3   :  { %v514_v14 = vadd.f32 %v1210_v61, %v513_v13  ;;  %650 = vmatmul.f32.gmra.mxu3 %v570_v11  ;;  %v563_v15 = vmax.f32 %v547_v12, 0.0 }
 0x1d5   :  { %v535_v16 = vmul.f32 %v1215_v62, %v514_v14  ;;  %629 = vmatmul.f32.gmra.mxu1 %v563_v15 }
 0x1d7   :  { %v555_v17 = vadd.f32 %v1221_v1, %v535_v16 }
 0x1d9   :  { %v571_v18 = vmax.f32 %v555_v17, 0.0 }
 0x1db   :  { %653 = vmatmul.f32.gmra.mxu3 %v571_v18 }
 0x21a   :  { %v609_v19 = vpop.f32.mrf.mxu1 }
 0x21b   :  { %v610_v21 = vadd.f32 %v931_v20, %v609_v19 }
 0x21d   :  { %v657_v23 = vmax.f32 %v610_v21, 0.0 }
 0x222   :  { %v612_v22 = vpop.f32.mrf.mxu1 }
 0x223   :  { %v613_v24 = vadd.f32 %v931_v20, %v612_v22 }
 0x225   :  { %v658_v25 = vmax.f32 %v613_v24, 0.0 }
 0x226   :  { %v633_v61 = vpop.f32.mrf.mxu3 }
 0x227   :  { %v810_v26 = vpack.c.bf16 %v658_v25, %v657_v23  ;;  %v634_v62 = vadd.f32 %v931_v20, %v633_v61 }
 0x229   :  { %811 = vst [vmem:[#allocation15] sm:$0xff] %v810_v26   ;;  %v665_v30 = vmax.f32 %v634_v62, 0.0 }
 0x22a   :  { %v615_v27 = vpop.f32.mrf.mxu1 }
 0x22b   :  { %v616_v29 = vadd.f32 %v931_v20, %v615_v27 }
 0x22d   :  { %v659_v33 = vmax.f32 %v616_v29, 0.0 }
 0x22e   :  { %v636_v28 = vpop.f32.mrf.mxu3 }
 0x22f   :  { %v637_v1 = vadd.f32 %v931_v20, %v636_v28 }
 0x231   :  { %v666_v31 = vmax.f32 %v637_v1, 0.0 }
 0x232   :  { %v618_v32 = vpop.f32.mrf.mxu1 }
 0x233   :  { %v830_v34 = vpack.c.bf16 %v666_v31, %v665_v30  ;;  %v619_v35 = vadd.f32 %v931_v20, %v618_v32 }
 0x235   :  { %857 = vst [vmem:[#allocation15 + $0x20] sm:$0xff] %v830_v34   ;;  %v660_v36 = vmax.f32 %v619_v35, 0.0 }
 0x236   :  { %v639_v37 = vpop.f32.mrf.mxu3 }
 0x237   :  { %v815_v38 = vpack.c.bf16 %v660_v36, %v659_v33  ;;  %v640_v40 = vadd.f32 %v931_v20, %v639_v37 }
 0x239   :  { %854 = vst [vmem:[#allocation15 + $0x8] sm:$0xff] %v815_v38   ;;  %v667_v44 = vmax.f32 %v640_v40, 0.0 }
 0x23a   :  { %v621_v39 = vpop.f32.mrf.mxu1 }
 0x23b   :  { %v622_v42 = vadd.f32 %v931_v20, %v621_v39 }
 0x23d   :  { %v661_v47 = vmax.f32 %v622_v42, 0.0 }
 0x23e   :  { %v642_v41 = vpop.f32.mrf.mxu3 }
 0x23f   :  { %v643_v43 = vadd.f32 %v931_v20, %v642_v41 }
 0x241   :  { %v668_v45 = vmax.f32 %v643_v43, 0.0 }
 0x242   :  { %v624_v46 = vpop.f32.mrf.mxu1 }
 0x243   :  { %v835_v48 = vpack.c.bf16 %v668_v45, %v667_v44  ;;  %v625_v49 = vadd.f32 %v931_v20, %v624_v46 }
 0x245   :  { %858 = vst [vmem:[#allocation15 + $0x28] sm:$0xff] %v835_v48   ;;  %v662_v50 = vmax.f32 %v625_v49, 0.0 }
 0x246   :  { %v645_v51 = vpop.f32.mrf.mxu3 }
 0x247   :  { %v820_v52 = vpack.c.bf16 %v662_v50, %v661_v47  ;;  %v646_v54 = vadd.f32 %v931_v20, %v645_v51 }
 0x249   :  { %855 = vst [vmem:[#allocation15 + $0x10] sm:$0xff] %v820_v52   ;;  %v669_v58 = vmax.f32 %v646_v54, 0.0 }
 0x24a   :  { %v627_v53 = vpop.f32.mrf.mxu1 }
 0x24b   :  { %v628_v56 = vadd.f32 %v931_v20, %v627_v53 }
 0x24d   :  { %v663_v63 = vmax.f32 %v628_v56, 0.0 }
 0x24e   :  { %v648_v55 = vpop.f32.mrf.mxu3 }
 0x24f   :  { %v649_v57 = vadd.f32 %v931_v20, %v648_v55 }
 0x251   :  { %v670_v59 = vmax.f32 %v649_v57, 0.0 }
 0x252   :  { %v630_v60 = vpop.f32.mrf.mxu1 }
 0x253   :  { %v840_v0 = vpack.c.bf16 %v670_v59, %v669_v58  ;;  %v631_v2 = vadd.f32 %v931_v20, %v630_v60 }
 0x255   :  { %859 = vst [vmem:[#allocation15 + $0x30] sm:$0xff] %v840_v0   ;;  %v664_v3 = vmax.f32 %v631_v2, 0.0 }
 0x256   :  { %v651_v4 = vpop.f32.mrf.mxu3 }
 0x257   :  { %v825_v5 = vpack.c.bf16 %v664_v3, %v663_v63  ;;  %v652_v6 = vadd.f32 %v931_v20, %v651_v4 }
 0x259   :  { %856 = vst [vmem:[#allocation15 + $0x18] sm:$0xff] %v825_v5   ;;  %v671_v9 = vmax.f32 %v652_v6, 0.0 }
 0x25e   :  { %v654_v7 = vpop.f32.mrf.mxu3 }
 0x25f   :  { %v655_v8 = vadd.f32 %v931_v20, %v654_v7 }
 0x261   :  { %v672_v10 = vmax.f32 %v655_v8, 0.0 }
 0x263   :  { %v845_v11 = vpack.c.bf16 %v672_v10, %v671_v9 }
 0x265   :  { %860 = vst [vmem:[#allocation15 + $0x38] sm:$0xff] %v845_v11  }
 0x266   :  { %717 = dma.vmem_to_hbm [thread:$0]  %s710_s10, 1024, %s712_s28, [#allocation8], %s1085_s24, %s1085_s24, %s1086_s25  }
 0x267   :  { %1082 = dma.done.wait [#allocation8], 1024  }
 0x268   :  { %1083 = vsyncadd [#allocation8], 4294966272 }
 0x269   :  { %722 = vsyncpa [#allocation7], 1 }
 0x26a   :  { %723 = vsyncpa [#allocation10], 1 }
 0x26b   :  { %724 = vsyncpa [#allocation13], 1 }
 0x26c   :  { %725 = vsyncpa [#allocation8], 1 }

</bundles_post_ra>
